<compile_context>
chip_gen: v5e
topology: v5e:2x2
jax: 0.10.0
libtpu: 0.0.40
codegen_flags: <defaults>
</compile_context>

<pallas_src>
import math

import jax
import jax.numpy as jnp
import numpy as np
from jax.experimental import pallas as pl
from jax.experimental.pallas import tpu as pltpu


# ----------------------------- Pallas kernel -------------------------------


def _layernorm(x, w, b, eps=1e-5):
    mu = jnp.mean(x, axis=-1, keepdims=True)
    var = jnp.mean((x - mu) ** 2, axis=-1, keepdims=True)
    return (x - mu) * jax.lax.rsqrt(var + eps) * w + b


def layer_kernel(
    xx_ref, h0_ref, gamma_ref, beta_ref,
    w_h2h_ref, lnh_w_ref, lnh_b_ref,
    w_x2h_ref, lnx_w_ref, lnx_b_ref,
    h_out_ref, in_layer_out_ref, g_out_ref, gpre_out_ref, ilp_out_ref,
):
    xx = xx_ref[...]                       # (B, P*N)  last time step, lane-dense
    hx = h0_ref[...]                       # (B, N)
    gamma = gamma_ref[...]                 # (1, P*N)
    beta = beta_ref[...]                   # (1, P*N)

    B, N = hx.shape
    PN = xx.shape[1]
    P = PN // N

    # Affine gate over the hidden state repeated across pathways (lane-dense).
    hx_rep = jnp.tile(hx, (1, P))                                   # (B, P*N)
    g_pre = gamma * hx_rep + beta                                   # (B, P*N)
    g = jax.nn.sigmoid(g_pre)
    in_layer_pre = g * xx                                           # (B, P*N)

    # Pathway sum via static lane slices (P is trace-time static, small).
    acc = in_layer_pre[:, 0:N]
    for p in range(1, P):
        acc = acc + in_layer_pre[:, p * N:(p + 1) * N]
    in_layer = jnp.maximum(acc, 0.0)                                # relu, (B, N)

    # ---------------- Integrator ----------------
    # h2h: Linear(N -> 2N, no bias) + LayerNorm(2N)
    h2h_lin = jnp.dot(hx, w_h2h_ref[...], preferred_element_type=jnp.float32)
    h2h = _layernorm(h2h_lin, lnh_w_ref[...], lnh_b_ref[...])       # (B, 2N)
    h_i = h2h[:, :N]
    h_g = h2h[:, N:]

    x_act = jnp.maximum(in_layer + h_i, 0.0)                        # relu

    # x2h: Linear(N -> N, no bias) + LayerNorm(N)
    x2h_lin = jnp.dot(x_act, w_x2h_ref[...], preferred_element_type=jnp.float32)
    x2h = _layernorm(x2h_lin, lnx_w_ref[...], lnx_b_ref[...])       # (B, N)

    gi = jax.nn.sigmoid(x2h + h_g)
    h = (1.0 - gi) * hx + gi * x_act                                # (B, N)

    # outputs (all lane-dense; wrapper does the final reshapes)
    h_out_ref[...] = h
    in_layer_out_ref[...] = in_layer
    g_out_ref[...] = g
    gpre_out_ref[...] = g_pre
    ilp_out_ref[...] = in_layer_pre


# ------------------------------ wrapper -------------------------------------


def layer_forward(xs_list, init_h, params):
    """xs_list: list of P arrays, each (B, N, T). init_h: (B, N)."""
    # Slice the last timestep BEFORE the call: never DMA the T axis.
    xx = jnp.stack([x[..., -1] for x in xs_list], axis=1).astype(jnp.float32)
    B, P, N = xx.shape
    xx_flat = xx.reshape(B, P * N)                     # lane-dense slab

    hx = init_h.astype(jnp.float32)
    gamma_flat = params["gamma"].reshape(1, P * N)
    beta_flat = params["beta"].reshape(1, P * N)

    out_shapes = (
        jax.ShapeDtypeStruct((B, N), jnp.float32),       # h
        jax.ShapeDtypeStruct((B, N), jnp.float32),       # in_layer
        jax.ShapeDtypeStruct((B, P * N), jnp.float32),   # g
        jax.ShapeDtypeStruct((B, P * N), jnp.float32),   # g_pre
        jax.ShapeDtypeStruct((B, P * N), jnp.float32),   # in_layer_pre
    )
    vmem = pl.BlockSpec(memory_space=pltpu.MemorySpace.VMEM)

    # Advisory cost hint for XLA scheduling around the custom call.
    in_bytes = 4 * (B * P * N + B * N + 2 * P * N
                    + N * 2 * N + 2 * 2 * N + N * N + 2 * N)
    out_bytes = 4 * (2 * B * N + 3 * B * P * N)
    ce = pl.CostEstimate(
        flops=6 * B * N * N + 10 * B * P * N,
        transcendentals=B * P * N + B * N + 2 * B,
        bytes_accessed=in_bytes + out_bytes,
    )

    h, in_layer, g_flat, gpre_flat, ilp_flat = pl.pallas_call(
        layer_kernel,
        out_shape=out_shapes,
        in_specs=[vmem] * 10,
        out_specs=tuple([vmem] * 5),
        cost_estimate=ce,
    )(
        xx_flat, hx, gamma_flat, beta_flat,
        params["w_h2h"], params["lnh_w"], params["lnh_b"],
        params["w_x2h"], params["lnx_w"], params["lnx_b"],
    )

    # Layout plumbing in the wrapper (cheap XLA reshapes), plus hx / xx
    # returned directly instead of round-tripping through the kernel.
    return (
        h[:, :, None],                    # (B, N, 1)
        in_layer,                         # (B, N)
        hx,                               # (B, N)
        xx,                               # (B, P, N)
        g_flat.reshape(B, P, N),          # (B, P, N)
        gpre_flat.reshape(B, P, N),       # (B, P, N)
        ilp_flat.reshape(B, P, N),        # (B, P, N)
    )


# --------------------------- parameter init ----------------------------------


def init_params(key, in_pathways, out_neurons, Tmax):
    P, N = in_pathways, out_neurons
    k1, k2, k3 = jax.random.split(key, 3)
    bound = 1.0 / math.sqrt(N)  # PyTorch Linear default init bound

    params = {
        # Affine([P, N], init_gamma=0.1, init_beta=1)
        "gamma": jnp.full((P, N), 0.1, dtype=jnp.float32),
        "beta": jnp.full((P, N), 1.0, dtype=jnp.float32),
        # Integrator.h2h = Linear(N, 2N, bias=False) + LayerNorm(2N, w=0.1, b=0)
        "w_h2h": jax.random.uniform(k1, (N, 2 * N), jnp.float32, -bound, bound),
        "lnh_w": jnp.full((1, 2 * N), 0.1, dtype=jnp.float32),
        "lnh_b": jnp.zeros((1, 2 * N), dtype=jnp.float32),
        # Integrator.x2h = Linear(N, N, bias=False) + LayerNorm(N, w=0.1,
        #                  b = -log(Uniform(1, Tmax-1)))
        "w_x2h": jax.random.uniform(k2, (N, N), jnp.float32, -bound, bound),
        "lnx_w": jnp.full((1, N), 0.1, dtype=jnp.float32),
        "lnx_b": -jnp.log(
            jax.random.uniform(k3, (1, N), jnp.float32, 1.0, float(Tmax - 1))
        ),
    }
    return params


# --------------------------- pure-JAX reference -------------------------------


def layer_forward_ref(xs_list, init_h, params):
    xs = jnp.stack(xs_list, axis=1).astype(jnp.float32)
    hx = init_h.astype(jnp.float32)
    xx = xs[..., -1]
    g_pre = params["gamma"][None] * hx[:, None, :] + params["beta"][None]
    g = jax.nn.sigmoid(g_pre)
    ilp = g * xx
    in_layer = jax.nn.relu(jnp.sum(ilp, axis=1))

    N = hx.shape[-1]
    h2h = _layernorm(hx @ params["w_h2h"], params["lnh_w"], params["lnh_b"])
    h_i, h_g = h2h[:, :N], h2h[:, N:]
    x_act = jax.nn.relu(in_layer + h_i)
    x2h = _layernorm(x_act @ params["w_x2h"], params["lnx_w"], params["lnx_b"])
    gi = jax.nn.sigmoid(x2h + h_g)
    h = (1.0 - gi) * hx + gi * x_act
    return h[:, :, None], in_layer, hx, xx, g, g_pre, ilp


# --------------------------------- main ---------------------------------------


if __name__ == "__main__":
    B, P, N, T, Tmax = 2, 4, 32, 8, 25

    key = jax.random.PRNGKey(0)
    k_params, k_xs, k_h = jax.random.split(key, 3)
    params = init_params(k_params, P, N, Tmax)

    xs_keys = jax.random.split(k_xs, P)
    xs_list = [jax.random.normal(k, (B, N, T), jnp.float32) for k in xs_keys]
    init_h = jax.random.normal(k_h, (B, N), jnp.float32)

    outs = layer_forward(xs_list, init_h, params)
    outs = jax.block_until_ready(outs)

    refs = layer_forward_ref(xs_list, init_h, params)
    for o, r in zip(outs, refs):
        np.testing.assert_allclose(np.asarray(o), np.asarray(r), rtol=1e-5, atol=1e-5)

    # TODO(synk): the custom `LayerNorm(dim=2, ...)` branch (with_layernorm=True)
    # and the EI excitatory/inhibitory split are not exercised (defaults used).
    # TODO(synk): if this cell is applied recurrently over T, fold the time loop
    # into the kernel (grid axis over T, weights resident in VMEM) and consider
    # bf16 matmul inputs for v6e/v7x (requires loosening the 1e-5 tolerance).
    print("KERNEL_OK")
</pallas_src>

<mosaic_0001>
module attributes {stable_mosaic.version = 11 : i64} {
  func.func @layer_kernel(%arg0: memref<2x128xf32, #tpu.memory_space<vmem>>, %arg1: memref<2x32xf32, #tpu.memory_space<vmem>>, %arg2: memref<1x128xf32, #tpu.memory_space<vmem>>, %arg3: memref<1x128xf32, #tpu.memory_space<vmem>>, %arg4: memref<32x64xf32, #tpu.memory_space<vmem>>, %arg5: memref<1x64xf32, #tpu.memory_space<vmem>>, %arg6: memref<1x64xf32, #tpu.memory_space<vmem>>, %arg7: memref<32x32xf32, #tpu.memory_space<vmem>>, %arg8: memref<1x32xf32, #tpu.memory_space<vmem>>, %arg9: memref<1x32xf32, #tpu.memory_space<vmem>>, %arg10: memref<2x32xf32, #tpu.memory_space<vmem>>, %arg11: memref<2x32xf32, #tpu.memory_space<vmem>>, %arg12: memref<2x128xf32, #tpu.memory_space<vmem>>, %arg13: memref<2x128xf32, #tpu.memory_space<vmem>>, %arg14: memref<2x128xf32, #tpu.memory_space<vmem>>) attributes {dimension_semantics = [], scalar_prefetch = 0 : i64, scratch_operands = 0 : i64, tpu.core_type = #tpu.core_type<tc>} {
    %c0 = arith.constant 0 : index
    %c0_0 = arith.constant 0 : index
    %0 = vector.load %arg0[%c0, %c0_0] : memref<2x128xf32, #tpu.memory_space<vmem>>, vector<2x128xf32>
    %c0_1 = arith.constant 0 : index
    %c0_2 = arith.constant 0 : index
    %1 = vector.load %arg1[%c0_1, %c0_2] : memref<2x32xf32, #tpu.memory_space<vmem>>, vector<2x32xf32>
    %c0_3 = arith.constant 0 : index
    %c0_4 = arith.constant 0 : index
    %2 = vector.load %arg2[%c0_3, %c0_4] : memref<1x128xf32, #tpu.memory_space<vmem>>, vector<1x128xf32>
    %c0_5 = arith.constant 0 : index
    %c0_6 = arith.constant 0 : index
    %3 = vector.load %arg3[%c0_5, %c0_6] : memref<1x128xf32, #tpu.memory_space<vmem>>, vector<1x128xf32>
    %4 = tpu.concatenate %1, %1, %1, %1 in 1 : vector<2x32xf32>, vector<2x32xf32>, vector<2x32xf32>, vector<2x32xf32> -> vector<2x128xf32>
    %5 = vector.broadcast %2 : vector<1x128xf32> to vector<2x128xf32>
    %6 = arith.mulf %5, %4 : vector<2x128xf32>
    %7 = vector.broadcast %3 : vector<1x128xf32> to vector<2x128xf32>
    %8 = arith.addf %6, %7 : vector<2x128xf32>
    %9 = arith.negf %8 : vector<2x128xf32>
    %10 = math.exp %9 : vector<2x128xf32>
    %cst = arith.constant 1.000000e+00 : f32
    %11 = vector.broadcast %cst : f32 to vector<2x128xf32>
    %12 = arith.addf %11, %10 : vector<2x128xf32>
    %13 = arith.divf %11, %12 : vector<2x128xf32>
    %14 = arith.mulf %13, %0 : vector<2x128xf32>
    %15 = vector.extract_strided_slice %14 {offsets = [0, 0], sizes = [2, 32], strides = [1, 1]} : vector<2x128xf32> to vector<2x32xf32>
    %16 = vector.extract_strided_slice %14 {offsets = [0, 32], sizes = [2, 32], strides = [1, 1]} : vector<2x128xf32> to vector<2x32xf32>
    %17 = arith.addf %15, %16 : vector<2x32xf32>
    %18 = vector.extract_strided_slice %14 {offsets = [0, 64], sizes = [2, 32], strides = [1, 1]} : vector<2x128xf32> to vector<2x32xf32>
    %19 = arith.addf %17, %18 : vector<2x32xf32>
    %20 = vector.extract_strided_slice %14 {offsets = [0, 96], sizes = [2, 32], strides = [1, 1]} : vector<2x128xf32> to vector<2x32xf32>
    %21 = arith.addf %19, %20 : vector<2x32xf32>
    %cst_7 = arith.constant 0.000000e+00 : f32
    %22 = vector.broadcast %cst_7 : f32 to vector<2x32xf32>
    %23 = arith.maximumf %21, %22 : vector<2x32xf32>
    %c0_8 = arith.constant 0 : index
    %c0_9 = arith.constant 0 : index
    %24 = vector.load %arg4[%c0_8, %c0_9] : memref<32x64xf32, #tpu.memory_space<vmem>>, vector<32x64xf32>
    %cst_10 = arith.constant dense<0.000000e+00> : vector<2x64xf32>
    %25 = tpu.matmul %1, %24, %cst_10 {dimension_numbers = #tpu.dot_dimension_numbers<[1], [0], [0], [1], [0, 0, 1, 1], [], []>} : vector<2x32xf32>, vector<32x64xf32>, vector<2x64xf32> -> vector<2x64xf32>
    %c0_11 = arith.constant 0 : index
    %c0_12 = arith.constant 0 : index
    %26 = vector.load %arg5[%c0_11, %c0_12] : memref<1x64xf32, #tpu.memory_space<vmem>>, vector<1x64xf32>
    %c0_13 = arith.constant 0 : index
    %c0_14 = arith.constant 0 : index
    %27 = vector.load %arg6[%c0_13, %c0_14] : memref<1x64xf32, #tpu.memory_space<vmem>>, vector<1x64xf32>
    %cst_15 = arith.constant dense<0.000000e+00> : vector<2xf32>
    %28 = vector.multi_reduction <add>, %25, %cst_15 [1] : vector<2x64xf32> to vector<2xf32>
    %29 = vector.shape_cast %28 : vector<2xf32> to vector<2x1xf32>
    %cst_16 = arith.constant 6.400000e+01 : f32
    %30 = vector.broadcast %cst_16 : f32 to vector<2x1xf32>
    %31 = arith.divf %29, %30 : vector<2x1xf32>
    %32 = vector.broadcast %31 : vector<2x1xf32> to vector<2x64xf32>
    %33 = arith.subf %25, %32 : vector<2x64xf32>
    %34 = arith.mulf %33, %33 : vector<2x64xf32>
    %cst_17 = arith.constant dense<0.000000e+00> : vector<2xf32>
    %35 = vector.multi_reduction <add>, %34, %cst_17 [1] : vector<2x64xf32> to vector<2xf32>
    %36 = vector.shape_cast %35 : vector<2xf32> to vector<2x1xf32>
    %cst_18 = arith.constant 6.400000e+01 : f32
    %37 = vector.broadcast %cst_18 : f32 to vector<2x1xf32>
    %38 = arith.divf %36, %37 : vector<2x1xf32>
    %39 = vector.broadcast %31 : vector<2x1xf32> to vector<2x64xf32>
    %40 = arith.subf %25, %39 : vector<2x64xf32>
    %cst_19 = arith.constant 9.99999974E-6 : f32
    %41 = vector.broadcast %cst_19 : f32 to vector<2x1xf32>
    %42 = arith.addf %38, %41 : vector<2x1xf32>
    %43 = math.rsqrt %42 : vector<2x1xf32>
    %44 = vector.broadcast %43 : vector<2x1xf32> to vector<2x64xf32>
    %45 = arith.mulf %40, %44 : vector<2x64xf32>
    %46 = vector.broadcast %26 : vector<1x64xf32> to vector<2x64xf32>
    %47 = arith.mulf %45, %46 : vector<2x64xf32>
    %48 = vector.broadcast %27 : vector<1x64xf32> to vector<2x64xf32>
    %49 = arith.addf %47, %48 : vector<2x64xf32>
    %50 = vector.extract_strided_slice %49 {offsets = [0, 0], sizes = [2, 32], strides = [1, 1]} : vector<2x64xf32> to vector<2x32xf32>
    %51 = vector.extract_strided_slice %49 {offsets = [0, 32], sizes = [2, 32], strides = [1, 1]} : vector<2x64xf32> to vector<2x32xf32>
    %52 = arith.addf %23, %50 : vector<2x32xf32>
    %cst_20 = arith.constant 0.000000e+00 : f32
    %53 = vector.broadcast %cst_20 : f32 to vector<2x32xf32>
    %54 = arith.maximumf %52, %53 : vector<2x32xf32>
    %c0_21 = arith.constant 0 : index
    %c0_22 = arith.constant 0 : index
    %55 = vector.load %arg7[%c0_21, %c0_22] : memref<32x32xf32, #tpu.memory_space<vmem>>, vector<32x32xf32>
    %cst_23 = arith.constant dense<0.000000e+00> : vector<2x32xf32>
    %56 = tpu.matmul %54, %55, %cst_23 {dimension_numbers = #tpu.dot_dimension_numbers<[1], [0], [0], [1], [0, 0, 1, 1], [], []>} : vector<2x32xf32>, vector<32x32xf32>, vector<2x32xf32> -> vector<2x32xf32>
    %c0_24 = arith.constant 0 : index
    %c0_25 = arith.constant 0 : index
    %57 = vector.load %arg8[%c0_24, %c0_25] : memref<1x32xf32, #tpu.memory_space<vmem>>, vector<1x32xf32>
    %c0_26 = arith.constant 0 : index
    %c0_27 = arith.constant 0 : index
    %58 = vector.load %arg9[%c0_26, %c0_27] : memref<1x32xf32, #tpu.memory_space<vmem>>, vector<1x32xf32>
    %cst_28 = arith.constant dense<0.000000e+00> : vector<2xf32>
    %59 = vector.multi_reduction <add>, %56, %cst_28 [1] : vector<2x32xf32> to vector<2xf32>
    %60 = vector.shape_cast %59 : vector<2xf32> to vector<2x1xf32>
    %cst_29 = arith.constant 3.200000e+01 : f32
    %61 = vector.broadcast %cst_29 : f32 to vector<2x1xf32>
    %62 = arith.divf %60, %61 : vector<2x1xf32>
    %63 = vector.broadcast %62 : vector<2x1xf32> to vector<2x32xf32>
    %64 = arith.subf %56, %63 : vector<2x32xf32>
    %65 = arith.mulf %64, %64 : vector<2x32xf32>
    %cst_30 = arith.constant dense<0.000000e+00> : vector<2xf32>
    %66 = vector.multi_reduction <add>, %65, %cst_30 [1] : vector<2x32xf32> to vector<2xf32>
    %67 = vector.shape_cast %66 : vector<2xf32> to vector<2x1xf32>
    %cst_31 = arith.constant 3.200000e+01 : f32
    %68 = vector.broadcast %cst_31 : f32 to vector<2x1xf32>
    %69 = arith.divf %67, %68 : vector<2x1xf32>
    %70 = vector.broadcast %62 : vector<2x1xf32> to vector<2x32xf32>
    %71 = arith.subf %56, %70 : vector<2x32xf32>
    %cst_32 = arith.constant 9.99999974E-6 : f32
    %72 = vector.broadcast %cst_32 : f32 to vector<2x1xf32>
    %73 = arith.addf %69, %72 : vector<2x1xf32>
    %74 = math.rsqrt %73 : vector<2x1xf32>
    %75 = vector.broadcast %74 : vector<2x1xf32> to vector<2x32xf32>
    %76 = arith.mulf %71, %75 : vector<2x32xf32>
    %77 = vector.broadcast %57 : vector<1x32xf32> to vector<2x32xf32>
    %78 = arith.mulf %76, %77 : vector<2x32xf32>
    %79 = vector.broadcast %58 : vector<1x32xf32> to vector<2x32xf32>
    %80 = arith.addf %78, %79 : vector<2x32xf32>
    %81 = arith.addf %80, %51 : vector<2x32xf32>
    %82 = arith.negf %81 : vector<2x32xf32>
    %83 = math.exp %82 : vector<2x32xf32>
    %cst_33 = arith.constant 1.000000e+00 : f32
    %84 = vector.broadcast %cst_33 : f32 to vector<2x32xf32>
    %85 = arith.addf %84, %83 : vector<2x32xf32>
    %86 = arith.divf %84, %85 : vector<2x32xf32>
    %cst_34 = arith.constant 1.000000e+00 : f32
    %87 = vector.broadcast %cst_34 : f32 to vector<2x32xf32>
    %88 = arith.subf %87, %86 : vector<2x32xf32>
    %89 = arith.mulf %88, %1 : vector<2x32xf32>
    %90 = arith.mulf %86, %54 : vector<2x32xf32>
    %91 = arith.addf %89, %90 : vector<2x32xf32>
    %c0_35 = arith.constant 0 : index
    %c0_36 = arith.constant 0 : index
    %92 = vector.load %arg10[%c0_35, %c0_36] : memref<2x32xf32, #tpu.memory_space<vmem>>, vector<2x32xf32>
    tpu.vector_store %arg10[%c0_35, %c0_36], %91 {strides = array<i32>} : memref<2x32xf32, #tpu.memory_space<vmem>>, vector<2x32xf32>,
    %c0_37 = arith.constant 0 : index
    %c0_38 = arith.constant 0 : index
    %93 = vector.load %arg11[%c0_37, %c0_38] : memref<2x32xf32, #tpu.memory_space<vmem>>, vector<2x32xf32>
    tpu.vector_store %arg11[%c0_37, %c0_38], %23 {strides = array<i32>} : memref<2x32xf32, #tpu.memory_space<vmem>>, vector<2x32xf32>,
    %c0_39 = arith.constant 0 : index
    %c0_40 = arith.constant 0 : index
    %94 = vector.load %arg12[%c0_39, %c0_40] : memref<2x128xf32, #tpu.memory_space<vmem>>, vector<2x128xf32>
    tpu.vector_store %arg12[%c0_39, %c0_40], %13 {strides = array<i32>} : memref<2x128xf32, #tpu.memory_space<vmem>>, vector<2x128xf32>,
    %c0_41 = arith.constant 0 : index
    %c0_42 = arith.constant 0 : index
    %95 = vector.load %arg13[%c0_41, %c0_42] : memref<2x128xf32, #tpu.memory_space<vmem>>, vector<2x128xf32>
    tpu.vector_store %arg13[%c0_41, %c0_42], %8 {strides = array<i32>} : memref<2x128xf32, #tpu.memory_space<vmem>>, vector<2x128xf32>,
    %c0_43 = arith.constant 0 : index
    %c0_44 = arith.constant 0 : index
    %96 = vector.load %arg14[%c0_43, %c0_44] : memref<2x128xf32, #tpu.memory_space<vmem>>, vector<2x128xf32>
    tpu.vector_store %arg14[%c0_43, %c0_44], %14 {strides = array<i32>} : memref<2x128xf32, #tpu.memory_space<vmem>>, vector<2x128xf32>,
    return
  }
}

</mosaic_0001>

<bundles_post_ra>
// kernel: tpu_custom_call.1
= control target key start
LH: loop header
LB: loop body
LE: loop exit
PB: predicated region body
PF: predicated region fallthrough
CT: control target
= control target key end

     0   :  { %20 = vsyncpa [#allocation3], 0  ;;  %s850_s0 = inlined_call_operand.hbm [shape: f32[2,128], index: 0, kind: input, shape index: {}]   ;;  %s851_s1 = inlined_call_operand.hbm [shape: f32[2,32], index: 1, kind: input, shape index: {}]   ;;  %s852_s2 = inlined_call_operand.vmem [shape: f32[1,128], index: 2, kind: input, shape index: {}]   ;;  %s853_s3 = inlined_call_operand.vmem [shape: f32[1,128], index: 3, kind: input, shape index: {}]   ;;  %s854_s4 = inlined_call_operand.hbm [shape: f32[32,64], index: 4, kind: input, shape index: {}]   ;;  %s855_s5 = inlined_call_operand.vmem [shape: f32[1,64], index: 5, kind: input, shape index: {}]   ;;  %s856_s6 = inlined_call_operand.vmem [shape: f32[1,64], index: 6, kind: input, shape index: {}]   ;;  %s857_s7 = inlined_call_operand.hbm [shape: f32[32,32], index: 7, kind: input, shape index: {}]   ;;  %s858_s8 = inlined_call_operand.vmem [shape: f32[1,32], index: 8, kind: input, shape index: {}]   ;;  %s859_s9 = inlined_call_operand.vmem [shape: f32[1,32], index: 9, kind: input, shape index: {}]   ;;  %s860_s10 = inlined_call_operand.hbm [shape: f32[2,32], index: 10, kind: output, shape index: {0}]   ;;  %s861_s11 = inlined_call_operand.hbm [shape: f32[2,32], index: 11, kind: output, shape index: {1}]   ;;  %s862_s12 = inlined_call_operand.hbm [shape: f32[2,128], index: 12, kind: output, shape index: {2}]   ;;  %s863_s13 = inlined_call_operand.hbm [shape: f32[2,128], index: 13, kind: output, shape index: {3}]   ;;  %s864_s14 = inlined_call_operand.hbm [shape: f32[2,128], index: 14, kind: output, shape index: {4}]  }
   0x1   :  { %21 = vsyncpa [#allocation6], 0 }
   0x2   :  { %22 = vsyncpa [#allocation9], 0 }
   0x3   :  { %23 = vsyncpa [#allocation4], 0 }
   0x4   :  { %24 = vsyncpa [#allocation12], 0  ;;  %s42_s15 = sshll.u32 %s851_s1, 4  ;;  %s43_s15 = int_to_ptr.hbm [resolvable:$true] %s42_s15 }
   0x5   :  { %25 = vsyncpa [#allocation15], 0  ;;  %s683_s16 = smov [#allocation5]   ;;  %s31_s20 = sshll.u32 %s850_s0, 4  ;;  %s32_s20 = int_to_ptr.hbm [resolvable:$true] %s31_s20 }
   0x6   :  { %s44_s17 = sshll.u32 %s683_s16, 4  ;;  %s684_s21 = smov [#allocation2]   ;;  %s45_s17 = int_to_ptr.vmem [resolvable:$true] %s44_s17 }
   0x7   :  { %47 = dma.hbm_to_vmem [thread:$0]  %s43_s15, 32, %s45_s17, [#allocation6]  }
   0x8   :  { %s33_s22 = sshll.u32 %s684_s21, 4  ;;  %s56_s25 = sshll.u32 %s854_s4, 4  ;;  %s34_s22 = int_to_ptr.vmem [resolvable:$true] %s33_s22  ;;  %s57_s25 = int_to_ptr.hbm [resolvable:$true] %s56_s25 }
   0x9   :  { %36 = dma.hbm_to_vmem [thread:$0]  %s32_s20, 32, %s34_s22, [#allocation3]  }
   0xa   :  { %s685_s1 = smov [#allocation7]   ;;  %s73_s29 = sshll.u32 %s857_s7, 4  ;;  %s74_s29 = int_to_ptr.hbm [resolvable:$true] %s73_s29 }
   0xb   :  { %s58_s26 = sshll.u32 %s685_s1, 4  ;;  %s686_s30 = smov 128   ;;  %s59_s26 = int_to_ptr.vmem [resolvable:$true] %s58_s26 }
   0xc   :  { %s687_s0 = smov 8   ;;  %s688_s15 = smov [#allocation8]  }
   0xd   :  { %64 = dma.hbm_to_vmem [thread:$0]  %s57_s25, 512, %s59_s26, [#allocation6], %s686_s30, %s686_s30, %s687_s0  }
   0xe   :  { %s75_s16 = sshll.u32 %s688_s15, 4  ;;  %s76_s16 = int_to_ptr.vmem [resolvable:$true] %s75_s16 }
   0xf   :  { %81 = dma.hbm_to_vmem [thread:$0]  %s74_s29, 512, %s76_s16, [#allocation9], %s686_s30, %s686_s30, %s687_s0  }
  0x10   :  { %671 = dma.done.wait [#allocation3], 32  }
  0x11   :  { %672 = vsyncadd [#allocation3], 4294967264 }
  0x12   :  { %673 = dma.done.wait [#allocation6], 544  }
  0x13   :  { %674 = vsyncadd [#allocation6], 4294966752 }
  0x14   :  { %675 = dma.done.wait [#allocation9], 512  }
  0x15   :  { %676 = vsyncadd [#allocation9], 4294966784  ;;  %v167_v0 = vld [vmem:[#allocation7 + $0x18] sm:$0xff]  ;;  %v166_v1 = vld [vmem:[#allocation7 + $0x10] sm:$0xff]  ;;  %s689_s4 = smov 32   ;;  %s690_s7 = smov 96  }
  0x16   :  { %182 = vmatpush.msra.mxu0 %v167_v0  ;;  %v786_v2 = vld [vmem:[#allocation5] sm:$0x3]  ;;  %v165_v3 = vld [vmem:[#allocation7 + $0x8] sm:$0xff]  ;;  %v164_v4 = vld [vmem:[#allocation7] sm:$0xff]  ;;  %vm116_vm0 = vcmask 261120   ;;  %s691_s17 = smov 64  }
  0x17   :  { %107 = vrot.lane.b32.xlu0 %v786_v2, %s689_s4  ;;  %113 = vrot.lane.b32.xlu1 %v786_v2, %s690_s7  ;;  %vm118_vm1 = vcmask 523264   ;;  %vm120_vm2 = vcmask 785408   ;;  %v433_v7 = vld [vmem:[%s852_s2] ss:$0 sm:$0xff]  ;;  %vm192_vm3 = vcmask 517120   ;;  %v692_v32 = vmov 64.0  }
  0x18   :  { %183 = vmatpush.msra.mxu0 %v166_v1  ;;  %v434_v11 = vld [vmem:[%s853_s3] ss:$0 sm:$0xff]  ;;  %v234_v45 = vld [vmem:[#allocation8 + $0x10] sm:$0xff]  ;;  %v233_v46 = vld [vmem:[#allocation8 + $0x8] sm:$0xff]  ;;  %vm261_vm9 = vcmask 254976   ;;  %s350_s24 = sshll.u32 %s861_s11, 4  ;;  %s351_s24 = int_to_ptr.hbm [resolvable:$true] %s350_s24 }
  0x19   :  { %v102_v28 = vld [vmem:[#allocation2] sm:$0x3]  ;;  %v232_v47 = vld [vmem:[#allocation8] sm:$0xff]  ;;  %s694_s25 = smov [#allocation11]   ;;  %s695_s26 = smov [#allocation14]  }
  0x1a   :  { %184 = vmatpush.msra.mxu0 %v165_v3  ;;  %v235_v44 = vld [vmem:[#allocation8 + $0x18] sm:$0xff]  ;;  %s348_s1 = sshll.u32 %s694_s25, 4  ;;  %s370_s27 = sshll.u32 %s695_s26, 4  ;;  %s349_s1 = int_to_ptr.vmem [resolvable:$true] %s348_s1  ;;  %s371_s27 = int_to_ptr.vmem [resolvable:$true] %s370_s27 }
  0x1b   :  { %251 = vmatpush.msra.mxu1 %v235_v44  ;;  %v435_v0 = vld [vmem:[%s855_s5] ss:$0 sm:$0xff]  ;;  %s372_s30 = sshll.u32 %s863_s13, 4  ;;  %s696_s0 = smov [#allocation13]   ;;  %s373_s30 = int_to_ptr.hbm [resolvable:$true] %s372_s30 }
  0x1c   :  { %185 = vmatpush.msra.mxu0 %v164_v4  ;;  %v436_v4 = vld [vmem:[%s856_s6] ss:$0 sm:$0xff]  ;;  %s359_s15 = sshll.u32 %s696_s0, 4  ;;  %s361_s11 = sshll.u32 %s862_s12, 4  ;;  %s360_s15 = int_to_ptr.vmem [resolvable:$true] %s359_s15  ;;  %s362_s11 = int_to_ptr.hbm [resolvable:$true] %s361_s11 }
  0x1d   :  { %414 = vmatmul.msk.f32.vlgmr.msra.gmra.mxu0 %vm116_vm0, %v786_v2  ;;  %252 = vmatpush.msra.mxu1 %v234_v45  ;;  %s383_s18 = sshll.u32 %s864_s14, 4  ;;  %s697_s19 = smov [#allocation16]   ;;  %s384_s18 = int_to_ptr.hbm [resolvable:$true] %s383_s18 }
  0x1e   :  { %s381_s20 = sshll.u32 %s697_s19, 4  ;;  %s339_s22 = sshll.u32 %s860_s10, 4  ;;  %s382_s20 = int_to_ptr.vmem [resolvable:$true] %s381_s20  ;;  %s340_s22 = int_to_ptr.hbm [resolvable:$true] %s339_s22 }
  0x1f   :  { %110 = vrot.lane.b32.xlu0 %v786_v2, %s691_s17  ;;  %253 = vmatpush.msra.mxu1 %v233_v46 }
  0x21   :  { %254 = vmatpush.msra.mxu1 %v232_v47 }
  0x89   :  { %v108_v5 = vpop.permute.xlu0 %107  ;;  %v114_v8 = vpop.permute.xlu1 %113 }
  0x8a   :  { %v117_v6 = vsel %vm116_vm0, %v786_v2, %v108_v5 }
  0x91   :  { %v111_v9 = vpop.permute.xlu0 %110 }
  0x92   :  { %v119_v10 = vsel %vm118_vm1, %v117_v6, %v111_v9 }
  0x93   :  { %v121_v12 = vsel %vm120_vm2, %v119_v10, %v114_v8 }
  0x94   :  { %v125_v13 = vmul.f32 %v433_v7, %v121_v12 }
  0x96   :  { %v129_v14 = vadd.f32 %v434_v11, %v125_v13  ;;  %v693_v11 = vmov 32.0  }
  0x98   :  { %v413_v15 = vmul.f32 -1.442695, %v129_v14  ;;  %330 = vst [vmem:[#allocation14] sm:$0x3] %v129_v14 }
  0x99   :  { %375 = dma.vmem_to_hbm [thread:$0]  %s371_s27, 32, %s373_s30, [#allocation15]  }
  0x9a   :  { %v187_v16 = vpop.f32.mrf.mxu0  ;;  %439 = vpow2.f32 %v413_v15 }
  0x9b   :  { %v193_v17 = vsel %vm192_vm3, %v187_v16, 0.0 }
  0x9c   :  { %194 = vadd.xlane.f32.xlu1 %v193_v17 }
  0xa0   :  { %v440_v18 = vpop.eup %439 }
  0xa1   :  { %v133_v19 = vadd.f32 1.0, %v440_v18 }
  0xa3   :  { %441 = vrcp.f32 %v133_v19  ;;  %v145_v22 = vand.u32 2147483648, %v133_v19  ;;  %vm139_vm4 = vweird.f32 %v133_v19  ;;  %v143_v24 = vand.u32 2147483647, %v133_v19 }
  0xa4   :  { %443 = vrcp.f32 %v692_v32  ;;  %v437_v32 = vld [vmem:[%s858_s8] ss:$0 sm:$0xff]  ;;  %s698_s8 = smov [#allocation10]  }
  0xa5   :  { %v146_v26 = vor.u32 1.1754944e-38, %v145_v22  ;;  %vm144_vm7 = vcmp.eq.f32.partialorder %v143_v24, 8.507059e+37 }
  0xa9   :  { %v442_v20 = vpop.eup %441 }
  0xaa   :  { %v135_v21 = vmul.f32 %v442_v20, %v133_v19  ;;  %vm140_vm5 = vweird.f32 %v442_v20  ;;  %v444_v33 = vpop.eup %443 }
  0xab   :  { %vm141_vm6 = vmor %vm139_vm4, %vm140_vm5  ;;  %v197_v34 = vmul.f32 64.0, %v444_v33  ;;  %vm201_vm8 = vweird.f32 %v444_v33 }
  0xac   :  { %v136_v23 = vsub.f32 1.0, %v135_v21 }
  0xad   :  { %v198_v35 = vsub.f32 1.0, %v197_v34  ;;  %v438_v34 = vld [vmem:[%s859_s9] ss:$0 sm:$0xff]  ;;  %s337_s9 = sshll.u32 %s698_s8, 4  ;;  %s338_s9 = int_to_ptr.vmem [resolvable:$true] %s337_s9 }
  0xae   :  { %v137_v25 = vmul.f32 %v442_v20, %v136_v23 }
  0xaf   :  { %v199_v36 = vmul.f32 %v444_v33, %v198_v35 }
  0xb0   :  { %v138_v27 = vadd.f32 %v442_v20, %v137_v25 }
  0xb1   :  { %v200_v37 = vadd.f32 %v444_v33, %v199_v36 }
  0xb2   :  { %v142_v29 = vsel %vm141_vm6, %v442_v20, %v138_v27 }
  0xb3   :  { %v147_v30 = vsel %vm144_vm7, %v146_v26, %v142_v29  ;;  %v202_v38 = vsel %vm201_vm8, %v444_v33, %v200_v37 }
  0xb4   :  { %v149_v31 = vmul.f32 %v147_v30, %v102_v28  ;;  %329 = vst [vmem:[#allocation13] sm:$0x3] %v147_v30 }
  0xb6   :  { %155 = vrot.lane.b32.xlu0 %v149_v31, %s691_s17  ;;  %331 = vst [vmem:[#allocation16] sm:$0x3] %v149_v31 }
  0xb7   :  { %386 = dma.vmem_to_hbm [thread:$0]  %s382_s20, 32, %s384_s18, [#allocation15]  }
  0xbe   :  { %159 = vrot.lane.b32.xlu0 %v149_v31, %s689_s4 }
 0x10f   :  { %v195_v39 = vpop.xlane.xlu1 %194 }
 0x110   :  { %v203_v40 = vmul.f32 %v202_v38, %v195_v39 }
 0x112   :  { %v204_v41 = vsub.f32 %v187_v16, %v203_v40 }
 0x114   :  { %v205_v42 = vmul.f32 %v204_v41, %v204_v41 }
 0x116   :  { %v206_v43 = vsel %vm192_vm3, %v205_v42, 0.0 }
 0x117   :  { %207 = vadd.xlane.f32.xlu2 %v206_v43 }
 0x128   :  { %v156_v50 = vpop.permute.xlu0 %155 }
 0x12f   :  { %151 = vrot.lane.b32.xlu2 %v149_v31, %s690_s7 }
 0x130   :  { %v160_v56 = vpop.permute.xlu0 %159 }
 0x18a   :  { %v208_v48 = vpop.xlane.xlu2 %207 }
 0x18b   :  { %v209_v49 = vmul.f32 %v208_v48, %v202_v38 }
 0x18d   :  { %v210_v51 = vadd.f32 1e-05, %v209_v49 }
 0x18f   :  { %445 = vrsqrt.f32 %v210_v51  ;;  %vm217_vm11 = vweird.f32 %v210_v51 }
 0x190   :  { %447 = vrcp.f32 %v693_v11 }
 0x192   :  { %v152_v52 = vpop.permute.xlu2 %151 }
 0x193   :  { %v154_v53 = vadd.f32 %v152_v52, %v149_v31 }
 0x195   :  { %v446_v54 = vpop.eup %445  ;;  %v158_v55 = vadd.f32 %v156_v50, %v154_v53 }
 0x196   :  { %v212_v57 = vmul.f32 %v446_v54, %v210_v51  ;;  %vm218_vm10 = vweird.f32 %v446_v54  ;;  %v448_v12 = vpop.eup %447 }
 0x197   :  { %v162_v58 = vadd.f32 %v160_v56, %v158_v55  ;;  %vm219_vm12 = vmor %vm217_vm11, %vm218_vm10  ;;  %v266_v13 = vmul.f32 32.0, %v448_v12  ;;  %vm270_vm13 = vweird.f32 %v448_v12 }
 0x198   :  { %v213_v59 = vmul.f32 %v446_v54, %v212_v57 }
 0x199   :  { %v163_v60 = vmax.f32 %v162_v58, 0.0  ;;  %v267_v14 = vsub.f32 1.0, %v266_v13 }
 0x19a   :  { %v214_v61 = vmul.f32 0.5, %v213_v59 }
 0x19b   :  { %328 = vst.msk [vmem:[#allocation11] sm:$0x3] %vm261_vm9, %v163_v60  ;;  %v268_v15 = vmul.f32 %v448_v12, %v267_v14 }
 0x19c   :  { %v215_v62 = vsub.f32 1.5, %v214_v61  ;;  %353 = dma.vmem_to_hbm [thread:$0]  %s349_s1, 32, %s351_s24, [#allocation12]  }
 0x19d   :  { %v269_v16 = vadd.f32 %v448_v12, %v268_v15  ;;  %364 = dma.vmem_to_hbm [thread:$0]  %s360_s15, 32, %s362_s11, [#allocation12]  }
 0x19e   :  { %v216_v63 = vmul.f32 %v446_v54, %v215_v62 }
 0x19f   :  { %v271_v17 = vsel %vm270_vm13, %v448_v12, %v269_v16 }
 0x1a0   :  { %v220_v1 = vsel %vm219_vm12, %v446_v54, %v216_v63 }
 0x1a1   :  { %v221_v3 = vmul.f32 %v220_v1, %v204_v41 }
 0x1a3   :  { %v225_v5 = vmul.f32 %v435_v0, %v221_v3 }
 0x1a5   :  { %v229_v6 = vadd.f32 %v436_v4, %v225_v5 }
 0x1a7   :  { %300 = vrot.lane.b32.xlu1 %v229_v6, %s690_s7  ;;  %v817_v7 = vadd.f32 %v229_v6, %v163_v60 }
 0x1a9   :  { %v231_v8 = vmax.f32 %v817_v7, 0.0 }
 0x1ab   :  { %415 = vmatmul.msk.f32.vlgmr.msra.gmra.mxu1 %vm116_vm0, %v231_v8 }
 0x219   :  { %v301_v38 = vpop.permute.xlu1 %300 }
 0x228   :  { %v256_v9 = vpop.f32.mrf.mxu1 }
 0x229   :  { %v262_v10 = vsel %vm261_vm9, %v256_v9, 0.0 }
 0x22a   :  { %263 = vadd.xlane.f32.xlu0 %v262_v10 }
 0x29d   :  { %v264_v18 = vpop.xlane.xlu0 %263 }
 0x29e   :  { %v272_v19 = vmul.f32 %v271_v17, %v264_v18 }
 0x2a0   :  { %v273_v20 = vsub.f32 %v256_v9, %v272_v19 }
 0x2a2   :  { %v274_v21 = vmul.f32 %v273_v20, %v273_v20 }
 0x2a4   :  { %v275_v22 = vsel %vm261_vm9, %v274_v21, 0.0 }
 0x2a5   :  { %276 = vadd.xlane.f32.xlu2 %v275_v22 }
 0x318   :  { %v277_v23 = vpop.xlane.xlu2 %276 }
 0x319   :  { %v278_v24 = vmul.f32 %v277_v23, %v271_v17 }
 0x31b   :  { %v279_v25 = vadd.f32 1e-05, %v278_v24 }
 0x31d   :  { %449 = vrsqrt.f32 %v279_v25  ;;  %vm286_vm15 = vweird.f32 %v279_v25 }
 0x323   :  { %v450_v26 = vpop.eup %449 }
 0x324   :  { %v281_v27 = vmul.f32 %v450_v26, %v279_v25  ;;  %vm287_vm14 = vweird.f32 %v450_v26 }
 0x325   :  { %vm288_vm0 = vmor %vm286_vm15, %vm287_vm14 }
 0x326   :  { %v282_v28 = vmul.f32 %v450_v26, %v281_v27 }
 0x328   :  { %v283_v29 = vmul.f32 0.5, %v282_v28 }
 0x32a   :  { %v284_v30 = vsub.f32 1.5, %v283_v29 }
 0x32c   :  { %v285_v31 = vmul.f32 %v450_v26, %v284_v30 }
 0x32e   :  { %v289_v33 = vsel %vm288_vm0, %v450_v26, %v285_v31 }
 0x32f   :  { %v290_v35 = vmul.f32 %v289_v33, %v273_v20 }
 0x331   :  { %v294_v36 = vmul.f32 %v437_v32, %v290_v35 }
 0x333   :  { %v298_v37 = vadd.f32 %v438_v34, %v294_v36 }
 0x335   :  { %v303_v39 = vadd.f32 %v301_v38, %v298_v37 }
 0x337   :  { %v416_v40 = vmul.f32 -1.442695, %v303_v39 }
 0x339   :  { %451 = vpow2.f32 %v416_v40 }
 0x33f   :  { %v452_v41 = vpop.eup %451 }
 0x340   :  { %v307_v42 = vadd.f32 1.0, %v452_v41 }
 0x342   :  { %453 = vrcp.f32 %v307_v42  ;;  %v319_v46 = vand.u32 2147483648, %v307_v42  ;;  %v317_v48 = vand.u32 2147483647, %v307_v42  ;;  %vm313_vm2 = vweird.f32 %v307_v42 }
 0x344   :  { %v320_v50 = vor.u32 1.1754944e-38, %v319_v46  ;;  %vm318_vm4 = vcmp.eq.f32.partialorder %v317_v48, 8.507059e+37 }
 0x348   :  { %v454_v43 = vpop.eup %453 }
 0x349   :  { %v309_v44 = vmul.f32 %v454_v43, %v307_v42  ;;  %vm314_vm1 = vweird.f32 %v454_v43 }
 0x34a   :  { %vm315_vm3 = vmor %vm313_vm2, %vm314_vm1 }
 0x34b   :  { %v310_v45 = vsub.f32 1.0, %v309_v44 }
 0x34d   :  { %v311_v47 = vmul.f32 %v454_v43, %v310_v45 }
 0x34f   :  { %v312_v49 = vadd.f32 %v454_v43, %v311_v47 }
 0x351   :  { %v316_v51 = vsel %vm315_vm3, %v454_v43, %v312_v49 }
 0x352   :  { %v321_v52 = vsel %vm318_vm4, %v320_v50, %v316_v51 }
 0x353   :  { %v323_v53 = vsub.f32 1.0, %v321_v52  ;;  %v325_v55 = vmul.f32 %v321_v52, %v231_v8 }
 0x355   :  { %v324_v54 = vmul.f32 %v323_v53, %v786_v2 }
 0x357   :  { %v326_v56 = vadd.f32 %v325_v55, %v324_v54 }
 0x359   :  { %327 = vst.msk [vmem:[#allocation10] sm:$0x3] %vm261_vm9, %v326_v56 }
 0x35a   :  { %342 = dma.vmem_to_hbm [thread:$0]  %s338_s9, 32, %s340_s22, [#allocation4]  }
 0x35b   :  { %677 = dma.done.wait [#allocation4], 32  }
 0x35c   :  { %678 = vsyncadd [#allocation4], 4294967264 }
 0x35d   :  { %679 = dma.done.wait [#allocation12], 64  }
 0x35e   :  { %680 = vsyncadd [#allocation12], 4294967232 }
 0x35f   :  { %681 = dma.done.wait [#allocation15], 64  }
 0x360   :  { %682 = vsyncadd [#allocation15], 4294967232 }
 0x361   :  { %407 = vsyncpa [#allocation3], 1 }
 0x362   :  { %408 = vsyncpa [#allocation6], 1 }
 0x363   :  { %409 = vsyncpa [#allocation9], 1 }
 0x364   :  { %410 = vsyncpa [#allocation4], 1 }
 0x365   :  { %411 = vsyncpa [#allocation12], 1 }
 0x366   :  { %412 = vsyncpa [#allocation15], 1 }

</bundles_post_ra>
